<compile_context>
chip_gen: v7x
topology: tpu7x:2x2x1
jax: 0.10.0
libtpu: 0.0.40
codegen_flags: <defaults>
</compile_context>

<pallas_src>
import jax
import jax.numpy as jnp
from jax.experimental import pallas as pl
from jax.experimental.pallas import tpu as pltpu


def policy_head_kernel(wc_ref, shift_ref, x_ref, wfc_ref, bfc_ref, o_ref, feat_ref):
    # wc_ref:    SMEM (2, C)        BN-folded 1x1-conv weights (scalar reads)
    # shift_ref: SMEM (2,)          BN-folded per-channel shift (includes conv bias)
    # x_ref:     VMEM (Nb, C*HW)    channel-major flattened NCHW rows (no transpose)
    # wfc_ref:   VMEM (2*HW, Pp)    fc weight, K = channel-major flatten (f32 or bf16)
    # bfc_ref:   VMEM (1, Pp)       fc bias (f32, lane-padded)
    # o_ref:     VMEM (Nb, Pp)      output slab (lane-dense)
    # feat_ref:  VMEM (Nb, 2*HW)    scratch: ReLU'd conv output in the FC dtype
    C = wc_ref.shape[1]
    HW = wfc_ref.shape[0] // 2

    # 1x1 conv (BN scale folded into wc, BN shift/bias folded into the init) + ReLU.
    # Each input plane is loaded from VMEM once and feeds both output channels
    # (scalar-broadcast VPU FMAs over the (Nb, HW) plane; slices start at c*HW,
    # a static multiple of 128 lanes for HW=256).
    x0 = x_ref[:, 0:HW].astype(jnp.float32)
    acc0 = shift_ref[0] + wc_ref[0, 0] * x0
    acc1 = shift_ref[1] + wc_ref[1, 0] * x0
    for c in range(1, C):                                    # static Python loop
        xc = x_ref[:, c * HW:(c + 1) * HW].astype(jnp.float32)
        acc0 = acc0 + wc_ref[0, c] * xc
        acc1 = acc1 + wc_ref[1, c] * xc
    feat_ref[:, 0:HW] = jnp.maximum(acc0, 0.0).astype(feat_ref.dtype)
    feat_ref[:, HW:2 * HW] = jnp.maximum(acc1, 0.0).astype(feat_ref.dtype)

    # Fused FC: one (Nb, 2*HW) @ (2*HW, Pp) MXU matmul, f32 accumulation.
    out = jnp.dot(feat_ref[...], wfc_ref[...], preferred_element_type=jnp.float32)
    o_ref[...] = (out + bfc_ref[...]).astype(o_ref.dtype)


def _round_up(a, b):
    return (a + b - 1) // b * b


def policy_head_forward(x_nchw, params, board_size, output_p, *,
                        fc_dtype=jnp.bfloat16, x_dtype=None, batch_block=512):
    """x_nchw: (N, C, H, W). Returns (N, output_p) float32.

    fc_dtype: FC matmul operand dtype (bf16 default; accumulation is always f32).
    x_dtype:  optional activation dtype (e.g. jnp.bfloat16 to halve x HBM traffic).
    batch_block: target batch rows per grid step (sublane-aligned inside).
    """
    N, C, H, W = x_nchw.shape
    assert H == board_size and W == board_size
    HW = H * W
    P = output_p
    Pp = _round_up(P, 128)                                   # lane-dense output width

    eps = 1e-5
    wc = params["conv_w"].reshape(2, C).astype(jnp.float32)
    bc = params["conv_b"].astype(jnp.float32)
    # Fold BN (eval mode) into the conv: y = (scale*wc) @ x + (scale*(bc-mean)+beta)
    scale = params["bn_gamma"] / jnp.sqrt(params["bn_var"] + eps)                    # (2,)
    wc_folded = (scale[:, None] * wc).astype(jnp.float32)                            # (2, C)
    shift = (scale * (bc - params["bn_mean"]) + params["bn_beta"]).astype(jnp.float32)

    # torch fc weight is (P, 2*HW) over the channel-major flatten of (N, 2, H, W);
    # transpose to (2*HW, P) and pad output lanes to Pp.
    wfc = jnp.pad(params["fc_w"].T, ((0, 0), (0, Pp - P))).astype(fc_dtype)          # (2*HW, Pp)
    bfc = jnp.pad(params["fc_b"], (0, Pp - P)).reshape(1, Pp).astype(jnp.float32)

    # x as a free channel-major view (no transpose, no extra HBM pass).
    x_flat = x_nchw.reshape(N, C * HW)
    if x_dtype is not None:
        x_flat = x_flat.astype(x_dtype)

    # Sublane-aligned batch tile; keep >= 2 grid steps when possible so the
    # "parallel" batch axis can shard across v7x's two TensorCores.
    Nb = min(_round_up(batch_block, 8), _round_up(N, 8))
    if N >= 16 and _round_up(N, Nb) // Nb < 2:
        Nb = _round_up((N + 1) // 2, 8)
    N_pad = _round_up(N, Nb)
    if N_pad != N:
        x_flat = jnp.pad(x_flat, ((0, N_pad - N), (0, 0)))

    out = pl.pallas_call(
        policy_head_kernel,
        out_shape=jax.ShapeDtypeStruct((N_pad, Pp), jnp.float32),
        grid=(N_pad // Nb,),
        in_specs=[
            pl.BlockSpec(memory_space=pltpu.MemorySpace.SMEM),      # wc_folded (2, C)
            pl.BlockSpec(memory_space=pltpu.MemorySpace.SMEM),      # shift (2,)
            pl.BlockSpec((Nb, C * HW), lambda n: (n, 0)),           # x slab (contiguous rows)
            pl.BlockSpec((2 * HW, Pp), lambda n: (0, 0)),           # fc weight (constant)
            pl.BlockSpec((1, Pp), lambda n: (0, 0)),                # fc bias (constant)
        ],
        out_specs=pl.BlockSpec((Nb, Pp), lambda n: (n, 0)),
        scratch_shapes=[pltpu.VMEM((Nb, 2 * HW), fc_dtype)],        # fused feat plane
        compiler_params=pltpu.CompilerParams(
            dimension_semantics=("parallel",),
            vmem_limit_bytes=64 * 1024 * 1024),
    )(wc_folded, shift, x_flat, wfc, bfc)

    return out[:N, :P]


def make_params(key, input_c, board_size, output_p):
    HW2 = 2 * board_size * board_size
    ks = jax.random.split(key, 8)
    return {
        "conv_w": jax.random.normal(ks[0], (2, input_c, 1, 1), jnp.float32) * 0.1,
        "conv_b": jax.random.normal(ks[1], (2,), jnp.float32) * 0.1,
        "bn_gamma": 1.0 + 0.1 * jax.random.normal(ks[2], (2,), jnp.float32),
        "bn_beta": 0.1 * jax.random.normal(ks[3], (2,), jnp.float32),
        "bn_mean": 0.05 * jax.random.normal(ks[4], (2,), jnp.float32),
        "bn_var": 1.0 + 0.1 * jax.random.uniform(ks[5], (2,), jnp.float32),
        "fc_w": jax.random.normal(ks[6], (output_p, HW2), jnp.float32) * 0.05,
        "fc_b": jax.random.normal(ks[7], (output_p,), jnp.float32) * 0.05,
    }


def reference_forward(x_nchw, params, board_size, output_p):
    """Plain-JAX replica of the PyTorch forward (BN in eval mode)."""
    N, C, H, W = x_nchw.shape
    eps = 1e-5
    wc = params["conv_w"].reshape(2, C)
    conv = jnp.einsum("oc,nchw->nohw", wc, x_nchw) + params["conv_b"][None, :, None, None]
    bn = (conv - params["bn_mean"][None, :, None, None]) / jnp.sqrt(
        params["bn_var"][None, :, None, None] + eps)
    bn = bn * params["bn_gamma"][None, :, None, None] + params["bn_beta"][None, :, None, None]
    feat = jnp.maximum(bn, 0.0)
    flat = feat.reshape(N, 2 * H * W)                     # channel-major, as torch .view
    return flat @ params["fc_w"].T + params["fc_b"]


if __name__ == "__main__":
    # Small, module-consistent shapes: batch=2, inputC=4, boardSize=16, outputP=32.
    N, C, BOARD, P = 2, 4, 16, 32
    key = jax.random.PRNGKey(0)
    kx, kp = jax.random.split(key)
    x = jax.random.normal(kx, (N, C, BOARD, BOARD), jnp.float32)
    params = make_params(kp, C, BOARD, P)

    ref = reference_forward(x, params, BOARD, P)

    # Full-precision FC path (bit-level check against the reference).
    out_f32 = jax.block_until_ready(
        policy_head_forward(x, params, BOARD, P, fc_dtype=jnp.float32))
    assert out_f32.shape == (N, P)
    assert jnp.allclose(out_f32, ref, atol=1e-4, rtol=1e-4), (
        f"f32 max abs err {jnp.max(jnp.abs(out_f32 - ref))}")

    # Default path: bf16 FC operands, f32 accumulation (MXU-native on v5e/v6e/v7x).
    out_bf16 = jax.block_until_ready(policy_head_forward(x, params, BOARD, P))
    assert jnp.allclose(out_bf16, ref, atol=3e-2, rtol=3e-2), (
        f"bf16-fc max abs err {jnp.max(jnp.abs(out_bf16 - ref))}")

    # Optional bf16 activations (halves x HBM traffic on this mem-bound kernel).
    out_bf16x = jax.block_until_ready(
        policy_head_forward(x, params, BOARD, P, x_dtype=jnp.bfloat16))
    assert jnp.allclose(out_bf16x, ref, atol=5e-2, rtol=5e-2), (
        f"bf16-x max abs err {jnp.max(jnp.abs(out_bf16x - ref))}")

    # Multi-step grid + batch-padding path (N not a multiple of the batch tile).
    N2 = 20
    x2 = jax.random.normal(jax.random.PRNGKey(1), (N2, C, BOARD, BOARD), jnp.float32)
    ref2 = reference_forward(x2, params, BOARD, P)
    out2 = jax.block_until_ready(
        policy_head_forward(x2, params, BOARD, P, fc_dtype=jnp.float32, batch_block=8))
    assert out2.shape == (N2, P)
    assert jnp.allclose(out2, ref2, atol=1e-4, rtol=1e-4), (
        f"multi-step max abs err {jnp.max(jnp.abs(out2 - ref2))}")

    print("KERNEL_OK")
</pallas_src>

<mosaic_0001>
module attributes {stable_mosaic.version = 11 : i64} {
  func.func @policy_head_kernel(%arg0: i32, %arg1: memref<2x4xf32, #tpu.memory_space<smem>>, %arg2: memref<2xf32, #tpu.memory_space<smem>>, %arg3: memref<8x1024xf32, #tpu.memory_space<vmem>>, %arg4: memref<512x128xf32, #tpu.memory_space<vmem>>, %arg5: memref<1x128xf32, #tpu.memory_space<vmem>>, %arg6: memref<8x128xf32, #tpu.memory_space<vmem>>, %arg7: memref<8x512xf32, #tpu.memory_space<vmem>>) attributes {dimension_semantics = [#tpu.dimension_semantics<parallel>], iteration_bounds = array<i64: 1>, scalar_prefetch = 0 : i64, scratch_operands = 1 : i64, tpu.core_type = #tpu.core_type<tc>, window_params = [{transform_indices = @transform_0, window_bounds = array<i64: 2, 4>}, {transform_indices = @transform_1, window_bounds = array<i64: 2>}, {transform_indices = @transform_2, window_bounds = array<i64: 8, 1024>}, {pipeline_mode = #tpu.pipeline_mode<synchronous>, transform_indices = @transform_3, window_bounds = array<i64: 512, 128>}, {pipeline_mode = #tpu.pipeline_mode<synchronous>, transform_indices = @transform_4, window_bounds = array<i64: 1, 128>}, {transform_indices = @transform_5, window_bounds = array<i64: 8, 128>}]} {
    %c0 = arith.constant 0 : index
    %c0_0 = arith.constant 0 : index
    %0 = vector.load %arg3[%c0, %c0_0] : memref<8x1024xf32, #tpu.memory_space<vmem>>, vector<8x256xf32>
    %c0_1 = arith.constant 0 : index
    %1 = memref.load %arg2[%c0_1] : memref<2xf32, #tpu.memory_space<smem>>
    %c0_2 = arith.constant 0 : index
    %c0_3 = arith.constant 0 : index
    %2 = memref.load %arg1[%c0_2, %c0_3] : memref<2x4xf32, #tpu.memory_space<smem>>
    %3 = vector.broadcast %2 : f32 to vector<8x256xf32>
    %4 = arith.mulf %3, %0 : vector<8x256xf32>
    %5 = vector.broadcast %1 : f32 to vector<8x256xf32>
    %6 = arith.addf %5, %4 : vector<8x256xf32>
    %c1 = arith.constant 1 : index
    %7 = memref.load %arg2[%c1] : memref<2xf32, #tpu.memory_space<smem>>
    %c1_4 = arith.constant 1 : index
    %c0_5 = arith.constant 0 : index
    %8 = memref.load %arg1[%c1_4, %c0_5] : memref<2x4xf32, #tpu.memory_space<smem>>
    %9 = vector.broadcast %8 : f32 to vector<8x256xf32>
    %10 = arith.mulf %9, %0 : vector<8x256xf32>
    %11 = vector.broadcast %7 : f32 to vector<8x256xf32>
    %12 = arith.addf %11, %10 : vector<8x256xf32>
    %c0_6 = arith.constant 0 : index
    %c256 = arith.constant 256 : index
    %13 = vector.load %arg3[%c0_6, %c256] : memref<8x1024xf32, #tpu.memory_space<vmem>>, vector<8x256xf32>
    %c0_7 = arith.constant 0 : index
    %c1_8 = arith.constant 1 : index
    %14 = memref.load %arg1[%c0_7, %c1_8] : memref<2x4xf32, #tpu.memory_space<smem>>
    %15 = vector.broadcast %14 : f32 to vector<8x256xf32>
    %16 = arith.mulf %15, %13 : vector<8x256xf32>
    %17 = arith.addf %6, %16 : vector<8x256xf32>
    %c1_9 = arith.constant 1 : index
    %c1_10 = arith.constant 1 : index
    %18 = memref.load %arg1[%c1_9, %c1_10] : memref<2x4xf32, #tpu.memory_space<smem>>
    %19 = vector.broadcast %18 : f32 to vector<8x256xf32>
    %20 = arith.mulf %19, %13 : vector<8x256xf32>
    %21 = arith.addf %12, %20 : vector<8x256xf32>
    %c0_11 = arith.constant 0 : index
    %c512 = arith.constant 512 : index
    %22 = vector.load %arg3[%c0_11, %c512] : memref<8x1024xf32, #tpu.memory_space<vmem>>, vector<8x256xf32>
    %c0_12 = arith.constant 0 : index
    %c2 = arith.constant 2 : index
    %23 = memref.load %arg1[%c0_12, %c2] : memref<2x4xf32, #tpu.memory_space<smem>>
    %24 = vector.broadcast %23 : f32 to vector<8x256xf32>
    %25 = arith.mulf %24, %22 : vector<8x256xf32>
    %26 = arith.addf %17, %25 : vector<8x256xf32>
    %c1_13 = arith.constant 1 : index
    %c2_14 = arith.constant 2 : index
    %27 = memref.load %arg1[%c1_13, %c2_14] : memref<2x4xf32, #tpu.memory_space<smem>>
    %28 = vector.broadcast %27 : f32 to vector<8x256xf32>
    %29 = arith.mulf %28, %22 : vector<8x256xf32>
    %30 = arith.addf %21, %29 : vector<8x256xf32>
    %c0_15 = arith.constant 0 : index
    %c768 = arith.constant 768 : index
    %31 = vector.load %arg3[%c0_15, %c768] : memref<8x1024xf32, #tpu.memory_space<vmem>>, vector<8x256xf32>
    %c0_16 = arith.constant 0 : index
    %c3 = arith.constant 3 : index
    %32 = memref.load %arg1[%c0_16, %c3] : memref<2x4xf32, #tpu.memory_space<smem>>
    %33 = vector.broadcast %32 : f32 to vector<8x256xf32>
    %34 = arith.mulf %33, %31 : vector<8x256xf32>
    %35 = arith.addf %26, %34 : vector<8x256xf32>
    %c1_17 = arith.constant 1 : index
    %c3_18 = arith.constant 3 : index
    %36 = memref.load %arg1[%c1_17, %c3_18] : memref<2x4xf32, #tpu.memory_space<smem>>
    %37 = vector.broadcast %36 : f32 to vector<8x256xf32>
    %38 = arith.mulf %37, %31 : vector<8x256xf32>
    %39 = arith.addf %30, %38 : vector<8x256xf32>
    %cst = arith.constant 0.000000e+00 : f32
    %40 = vector.broadcast %cst : f32 to vector<8x256xf32>
    %41 = arith.maximumf %35, %40 : vector<8x256xf32>
    %c0_19 = arith.constant 0 : index
    %c0_20 = arith.constant 0 : index
    %42 = vector.load %arg7[%c0_19, %c0_20] : memref<8x512xf32, #tpu.memory_space<vmem>>, vector<8x256xf32>
    tpu.vector_store %arg7[%c0_19, %c0_20], %41 {strides = array<i32>} : memref<8x512xf32, #tpu.memory_space<vmem>>, vector<8x256xf32>,
    %cst_21 = arith.constant 0.000000e+00 : f32
    %43 = vector.broadcast %cst_21 : f32 to vector<8x256xf32>
    %44 = arith.maximumf %39, %43 : vector<8x256xf32>
    %c0_22 = arith.constant 0 : index
    %c256_23 = arith.constant 256 : index
    %45 = vector.load %arg7[%c0_22, %c256_23] : memref<8x512xf32, #tpu.memory_space<vmem>>, vector<8x256xf32>
    tpu.vector_store %arg7[%c0_22, %c256_23], %44 {strides = array<i32>} : memref<8x512xf32, #tpu.memory_space<vmem>>, vector<8x256xf32>,
    %c0_24 = arith.constant 0 : index
    %c0_25 = arith.constant 0 : index
    %46 = vector.load %arg7[%c0_24, %c0_25] : memref<8x512xf32, #tpu.memory_space<vmem>>, vector<8x512xf32>
    %c0_26 = arith.constant 0 : index
    %c0_27 = arith.constant 0 : index
    %47 = vector.load %arg4[%c0_26, %c0_27] : memref<512x128xf32, #tpu.memory_space<vmem>>, vector<512x128xf32>
    %cst_28 = arith.constant dense<0.000000e+00> : vector<8x128xf32>
    %48 = tpu.matmul %46, %47, %cst_28 {dimension_numbers = #tpu.dot_dimension_numbers<[1], [0], [0], [1], [0, 0, 1, 1], [], []>} : vector<8x512xf32>, vector<512x128xf32>, vector<8x128xf32> -> vector<8x128xf32>
    %c0_29 = arith.constant 0 : index
    %c0_30 = arith.constant 0 : index
    %49 = vector.load %arg5[%c0_29, %c0_30] : memref<1x128xf32, #tpu.memory_space<vmem>>, vector<1x128xf32>
    %50 = vector.broadcast %49 : vector<1x128xf32> to vector<8x128xf32>
    %51 = arith.addf %48, %50 : vector<8x128xf32>
    %c0_31 = arith.constant 0 : index
    %c0_32 = arith.constant 0 : index
    %52 = vector.load %arg6[%c0_31, %c0_32] : memref<8x128xf32, #tpu.memory_space<vmem>>, vector<8x128xf32>
    tpu.vector_store %arg6[%c0_31, %c0_32], %51 {strides = array<i32>} : memref<8x128xf32, #tpu.memory_space<vmem>>, vector<8x128xf32>,
    return
  }
  func.func @transform_0(%arg0: i32) -> (i32, i32) {
    %c0_i32 = arith.constant 0 : i32
    %c0_i32_0 = arith.constant 0 : i32
    %c0_i32_1 = arith.constant 0 : i32
    return %c0_i32, %c0_i32_0 : i32, i32
  }
  func.func @transform_1(%arg0: i32) -> i32 {
    %c0_i32 = arith.constant 0 : i32
    %c0_i32_0 = arith.constant 0 : i32
    return %c0_i32 : i32
  }
  func.func @transform_2(%arg0: i32) -> (i32, i32) {
    %c0_i32 = arith.constant 0 : i32
    %c0_i32_0 = arith.constant 0 : i32
    return %arg0, %c0_i32 : i32, i32
  }
  func.func @transform_3(%arg0: i32) -> (i32, i32) {
    %c0_i32 = arith.constant 0 : i32
    %c0_i32_0 = arith.constant 0 : i32
    %c0_i32_1 = arith.constant 0 : i32
    return %c0_i32, %c0_i32_0 : i32, i32
  }
  func.func @transform_4(%arg0: i32) -> (i32, i32) {
    %c0_i32 = arith.constant 0 : i32
    %c0_i32_0 = arith.constant 0 : i32
    %c0_i32_1 = arith.constant 0 : i32
    return %c0_i32, %c0_i32_0 : i32, i32
  }
  func.func @transform_5(%arg0: i32) -> (i32, i32) {
    %c0_i32 = arith.constant 0 : i32
    %c0_i32_0 = arith.constant 0 : i32
    return %arg0, %c0_i32 : i32, i32
  }
}

</mosaic_0001>

<bundles_post_ra>
// kernel: tpu_custom_call.1
= control target key start
LH: loop header
LB: loop body
LE: loop exit
PB: predicated region body
PF: predicated region fallthrough
CT: control target
= control target key end

     0   :  { %10 = vsyncpa [#allocation6], 0  ;;  %s832_s0 = inlined_call_operand.hbm [shape: f32[2,4], index: 0, kind: input, shape index: {}]   ;;  %s833_s1 = inlined_call_operand.hbm [shape: f32[2], index: 1, kind: input, shape index: {}]   ;;  %s834_s2 = inlined_call_operand.hbm [shape: f32[8,1024], index: 2, kind: input, shape index: {}]   ;;  %s835_s3 = inlined_call_operand.hbm [shape: f32[512,128], index: 3, kind: input, shape index: {}]   ;;  %s836_s4 = inlined_call_operand.hbm [shape: f32[1,128], index: 4, kind: input, shape index: {}]   ;;  %s837_s5 = inlined_call_operand.hbm [shape: f32[8,128], index: 5, kind: output, shape index: {}]  }
   0x1   :  { %11 = vsyncpa [#allocation8], 0 }
   0x2   :  { %12 = vsyncpa [#allocation4], 0 }
   0x3   :  { %13 = vsyncpa [#allocation11], 0 }
   0x4   :  { %14 = vsyncpa [#allocation5], 0  ;;  %s650_s18 = smov [#allocation10]   ;;  %s532_s22 = scalar_lea.hbm %s835_s3, 8192 }
   0x5   :  { %s46_s19 = sshll.u32 %s650_s18, 4  ;;  %p533_p0 = scmp.ne.s32.totalorder %s835_s3, %s532_s22  ;;  %s47_s19 = int_to_ptr.vmem [resolvable:$true] %s46_s19 }
   0x6   :  { %p536_p1 = scmp.lt.u32.totalorder %s532_s22, %s835_s3 }
   0x8   :  { %p538_p2 = pnand %p536_p1, %p533_p0 }
   0xa   :  { %541 = shalt.err (!%p538_p2)
}
   0xb   :  { %s542_s27 = scalar_lea.vmem %s47_s19, 8192  ;;  %p547_p4 = scmp.lt.s32.totalorder %s47_s19, %s47_s19 }
   0xc   :  { %p543_p3 = scmp.ne.s32.totalorder %s47_s19, %s542_s27  ;;  %p548_p5 = scmp.lt.s32.totalorder %s542_s27, %s542_s27 }
   0xe   :  { %p549_p6 = por %p548_p5, %p547_p4 }
  0x10   :  { %p550_p7 = pnand %p549_p6, %p543_p3 }
  0x12   :  { %553 = shalt.err (!%p550_p7)
}
  0x13   :  { %s651_s28 = smov 128   ;;  %s652_s29 = smov 8  }
  0x14   :  { %52 = dma.hbm_to_vmem [thread:$0]  %s835_s3, 8192, %s47_s19, [#allocation11], %s651_s28, %s651_s28, %s652_s29  }
  0x15   :  { %s554_s9 = scalar_lea.hbm %s832_s0, 32 }
  0x16   :  { %p555_p8 = scmp.ne.s32.totalorder %s832_s0, %s554_s9  ;;  %p558_p9 = scmp.lt.u32.totalorder %s554_s9, %s832_s0 }
  0x18   :  { %p560_p10 = pnand %p558_p9, %p555_p8 }
  0x1a   :  { %563 = shalt.err (!%p560_p10)
}
  0x1b   :  { %s653_s14 = smov [#allocation3]   ;;  %s564_s18 = scalar_lea.hbm %s833_s1, 16 }
  0x1c   :  { %22 = dma.hbm_to_smem %s832_s0, 32, %s653_s14, [#allocation6]  }
  0x1d   :  { %p565_p11 = scmp.ne.s32.totalorder %s833_s1, %s564_s18  ;;  %p568_p12 = scmp.lt.u32.totalorder %s564_s18, %s833_s1 }
  0x1f   :  { %p570_p13 = pnand %p568_p12, %p565_p11 }
  0x21   :  { %573 = shalt.err (!%p570_p13)
}
  0x22   :  { %s654_s23 = smov [#allocation7]   ;;  %s655_s0 = smov [#allocation9]  }
  0x23   :  { %30 = dma.hbm_to_smem %s833_s1, 16, %s654_s23, [#allocation8]  }
  0x24   :  { %s37_s26 = sshll.u32 %s655_s0, 4  ;;  %s656_s27 = smov [#allocation12]   ;;  %s38_s26 = int_to_ptr.vmem [resolvable:$true] %s37_s26 }
  0x25   :  { %s59_s28 = sshll.u32 %s656_s27, 4  ;;  %s574_s6 = scalar_lea.hbm %s834_s2, 1024  ;;  %s60_s28 = int_to_ptr.vmem [resolvable:$true] %s59_s28 }
  0x26   :  { %p575_p0 = scmp.ne.s32.totalorder %s834_s2, %s574_s6  ;;  %p578_p1 = scmp.lt.u32.totalorder %s574_s6, %s834_s2 }
  0x28   :  { %p580_p2 = pnand %p578_p1, %p575_p0 }
  0x2a   :  { %583 = shalt.err (!%p580_p2)
}
  0x2b   :  { %s584_s1 = scalar_lea.vmem %s38_s26, 1024  ;;  %p589_p4 = scmp.lt.s32.totalorder %s38_s26, %s38_s26 }
  0x2c   :  { %p585_p3 = scmp.ne.s32.totalorder %s38_s26, %s584_s1  ;;  %p590_p5 = scmp.lt.s32.totalorder %s584_s1, %s584_s1 }
  0x2e   :  { %p591_p6 = por %p590_p5, %p589_p4 }
  0x30   :  { %p592_p7 = pnand %p591_p6, %p585_p3 }
  0x32   :  { %595 = shalt.err (!%p592_p7)
}
  0x33   :  { %40 = dma.hbm_to_vmem [thread:$0]  %s834_s2, 1024, %s38_s26, [#allocation4]  }
  0x34   :  { %s596_s15 = scalar_lea.hbm %s836_s4, 16 }
  0x35   :  { %p597_p8 = scmp.ne.s32.totalorder %s836_s4, %s596_s15  ;;  %p600_p9 = scmp.lt.u32.totalorder %s596_s15, %s836_s4 }
  0x37   :  { %p602_p10 = pnand %p600_p9, %p597_p8 }
  0x39   :  { %605 = shalt.err (!%p602_p10)
}
  0x3a   :  { %s606_s19 = scalar_lea.vmem %s60_s28, 16  ;;  %s610_s20 = scalar_lea.vmem %s60_s28, 32 }
  0x3b   :  { %p607_p11 = scmp.ne.s32.totalorder %s60_s28, %s606_s19  ;;  %p611_p12 = scmp.lt.s32.totalorder %s60_s28, %s60_s28 }
  0x3c   :  { %p612_p13 = scmp.lt.s32.totalorder %s610_s20, %s606_s19 }
  0x3e   :  { %p613_p0 = por %p612_p13, %p611_p12 }
  0x40   :  { %p614_p1 = pnand %p613_p0, %p607_p11 }
  0x42   :  { %617 = shalt.err (!%p614_p1)
}
  0x43   :  { %62 = dma.hbm_to_vmem [thread:$0]  %s836_s4, 16, %s60_s28, [#allocation11]  }
  0x44   :  { %640 = dma.done.wait [#allocation6], 32  }
  0x45   :  { %641 = vsyncadd [#allocation6], 4294967264 }
  0x46   :  { %642 = dma.done.wait [#allocation8], 16  }
  0x47   :  { %643 = vsyncadd [#allocation8], 4294967280 }
  0x48   :  { %644 = dma.done.wait [#allocation4], 1024  }
  0x49   :  { %645 = vsyncadd [#allocation4], 4294966272 }
  0x4a   :  { %646 = dma.done.wait [#allocation11], 8208  }
  0x4b   :  { %647 = vsyncadd [#allocation11], 4294959088 }
  0x4c   :  { %78 = sfence }
  0x4d   :  { %v167_v0 = vld [vmem:[#allocation10 + $0x80] sm:$0xff]  ;;  %v168_v1 = vld [vmem:[#allocation10 + $0x88] sm:$0xff]  ;;  %v169_v11 = vld [vmem:[#allocation10 + $0x90] sm:$0xff]  ;;  %s748_s4 = sld [smem:[#allocation7]]  ;;  %s752_s23 = sld [smem:[#allocation3 + $0x1]] }
  0x4e   :  { %v151_v2 = vld [vmem:[#allocation10] sm:$0xff]  ;;  %v460_v3 = vpack.c.bf16 %v168_v1, %v167_v0  ;;  %v152_v4 = vld [vmem:[#allocation10 + $0x8] sm:$0xff]  ;;  %v170_v13 = vld [vmem:[#allocation10 + $0x98] sm:$0xff]  ;;  %s750_s22 = sld [smem:[#allocation3]]  ;;  %s754_s24 = sld [smem:[#allocation3 + $0x2]] }
  0x4f   :  { %v199_v5 = vld [vmem:[#allocation10 + $0x180] sm:$0xff]  ;;  %v200_v6 = vld [vmem:[#allocation10 + $0x188] sm:$0xff]  ;;  %v462_v7 = vpack.c.bf16 %v152_v4, %v151_v2  ;;  %v153_v14 = vld [vmem:[#allocation10 + $0x10] sm:$0xff]  ;;  %v464_v16 = vpack.c.bf16 %v170_v13, %v169_v11  ;;  %s756_s25 = sld [smem:[#allocation3 + $0x3]]  ;;  %s758_s0 = sld [smem:[#allocation7 + $0x1]] }
  0x50   :  { %v492_v8 = vpack.c.bf16 %v200_v6, %v199_v5  ;;  %v183_v9 = vld [vmem:[#allocation10 + $0x100] sm:$0xff]  ;;  %v184_v10 = vld [vmem:[#allocation10 + $0x108] sm:$0xff]  ;;  %461 = vmatprep.subr.bf16.mxu0 %v460_v3  ;;  %v154_v15 = vld [vmem:[#allocation10 + $0x18] sm:$0xff]  ;;  %s760_s26 = sld [smem:[#allocation3 + $0x80]]  ;;  %s762_s27 = sld [smem:[#allocation3 + $0x81]] }
  0x51   :  { %v494_v12 = vpack.c.bf16 %v184_v10, %v183_v9  ;;  %463 = vmatpush3.bf16.msra.mxu0 %v462_v7  ;;  %v466_v17 = vpack.c.bf16 %v154_v15, %v153_v14  ;;  %v201_v18 = vld [vmem:[#allocation10 + $0x190] sm:$0xff]  ;;  %v202_v19 = vld [vmem:[#allocation10 + $0x198] sm:$0xff]  ;;  %v171_v23 = vld [vmem:[#allocation10 + $0xa0] sm:$0xff]  ;;  %s764_s28 = sld [smem:[#allocation3 + $0x82]]  ;;  %s766_s29 = sld [smem:[#allocation3 + $0x83]] }
  0x52   :  { %493 = vmatprep.subr.bf16.mxu1 %v492_v8  ;;  %v185_v20 = vld [vmem:[#allocation10 + $0x110] sm:$0xff]  ;;  %v496_v21 = vpack.c.bf16 %v202_v19, %v201_v18  ;;  %v186_v22 = vld [vmem:[#allocation10 + $0x118] sm:$0xff]  ;;  %v172_v24 = vld [vmem:[#allocation10 + $0xa8] sm:$0xff]  ;;  %465 = vmatprep.subr.bf16.mxu0 %v464_v16  ;;  %s657_s30 = smov [#allocation13]  }
  0x53   :  { %495 = vmatpush3.bf16.msra.mxu1 %v494_v12  ;;  %v498_v25 = vpack.c.bf16 %v186_v22, %v185_v20  ;;  %v468_v26 = vpack.c.bf16 %v172_v24, %v171_v23  ;;  %v155_v27 = vld [vmem:[#allocation10 + $0x20] sm:$0xff]  ;;  %v156_v28 = vld [vmem:[#allocation10 + $0x28] sm:$0xff]  ;;  %v173_v35 = vld [vmem:[#allocation10 + $0xb0] sm:$0xff]  ;;  %v86_v6 = vstv %s748_s4  ;;  %v100_v13 = vstv %s752_s23  ;;  %s369_s6 = sshll.u32 %s657_s30, 4  ;;  %s370_s6 = int_to_ptr.vmem [resolvable:$true] %s369_s6 }
  0x54   :  { %v203_v29 = vld [vmem:[#allocation10 + $0x1a0] sm:$0xff]  ;;  %497 = vmatprep.subr.bf16.mxu1 %v496_v21  ;;  %v204_v30 = vld [vmem:[#allocation10 + $0x1a8] sm:$0xff]  ;;  %v470_v33 = vpack.c.bf16 %v156_v28, %v155_v27  ;;  %v174_v36 = vld [vmem:[#allocation10 + $0xb8] sm:$0xff]  ;;  %v83_v12 = vstv %s750_s22  ;;  %v114_v18 = vstv %s754_s24  ;;  %s618_s7 = scalar_lea.vmem %s370_s6, 128  ;;  %p623_p3 = scmp.lt.s32.totalorder %s370_s6, %s370_s6 }
  0x55   :  { %v187_v31 = vld [vmem:[#allocation10 + $0x120] sm:$0xff]  ;;  %v188_v32 = vld [vmem:[#allocation10 + $0x128] sm:$0xff]  ;;  %467 = vmatpush3.bf16.msra.mxu0 %v466_v17  ;;  %v500_v34 = vpack.c.bf16 %v204_v30, %v203_v29  ;;  %v157_v37 = vld [vmem:[#allocation10 + $0x30] sm:$0xff]  ;;  %v472_v39 = vpack.c.bf16 %v174_v36, %v173_v35  ;;  %v128_v19 = vstv %s756_s25  ;;  %v94_v20 = vstv %s758_s0  ;;  %p619_p2 = scmp.ne.s32.totalorder %s370_s6, %s618_s7  ;;  %p624_p4 = scmp.lt.s32.totalorder %s618_s7, %s618_s7 }
  0x56   :  { %469 = vmatprep.subr.bf16.mxu0 %v468_v26  ;;  %v502_v38 = vpack.c.bf16 %v188_v32, %v187_v31  ;;  %v158_v40 = vld [vmem:[#allocation10 + $0x38] sm:$0xff]  ;;  %v205_v41 = vld [vmem:[#allocation10 + $0x1b0] sm:$0xff]  ;;  %v175_v46 = vld [vmem:[#allocation10 + $0xc0] sm:$0xff]  ;;  %v106_v26 = vstv %s762_s27 }
  0x57   :  { %499 = vmatpush3.bf16.msra.mxu1 %v498_v25  ;;  %v206_v42 = vld [vmem:[#allocation10 + $0x1b8] sm:$0xff]  ;;  %v189_v44 = vld [vmem:[#allocation10 + $0x130] sm:$0xff]  ;;  %v176_v47 = vld [vmem:[#allocation10 + $0xc8] sm:$0xff]  ;;  %v474_v50 = vpack.c.bf16 %v158_v40, %v157_v37  ;;  %v91_v25 = vstv %s760_s26  ;;  %v120_v27 = vstv %s764_s28  ;;  %p625_p5 = por %p624_p4, %p623_p3 }
  0x58   :  { %501 = vmatprep.subr.bf16.mxu1 %v500_v34  ;;  %v504_v43 = vpack.c.bf16 %v206_v42, %v205_v41  ;;  %v190_v45 = vld [vmem:[#allocation10 + $0x138] sm:$0xff]  ;;  %v159_v48 = vld [vmem:[#allocation10 + $0x40] sm:$0xff]  ;;  %v160_v49 = vld [vmem:[#allocation10 + $0x48] sm:$0xff]  ;;  %v476_v55 = vpack.c.bf16 %v176_v47, %v175_v46 }
  0x59   :  { %471 = vmatpush3.bf16.msra.mxu0 %v470_v33  ;;  %v207_v51 = vld [vmem:[#allocation10 + $0x1c0] sm:$0xff]  ;;  %v208_v52 = vld [vmem:[#allocation10 + $0x1c8] sm:$0xff]  ;;  %v506_v54 = vpack.c.bf16 %v190_v45, %v189_v44  ;;  %v177_v57 = vld [vmem:[#allocation10 + $0xd0] sm:$0xff]  ;;  %v478_v2 = vpack.c.bf16 %v160_v49, %v159_v48  ;;  %p626_p6 = pnand %p625_p5, %p619_p2 }
  0x5a   :  { %v191_v53 = vld [vmem:[#allocation10 + $0x140] sm:$0xff]  ;;  %473 = vmatprep.subr.bf16.mxu0 %v472_v39  ;;  %v192_v56 = vld [vmem:[#allocation10 + $0x148] sm:$0xff]  ;;  %v178_v58 = vld [vmem:[#allocation10 + $0xd8] sm:$0xff]  ;;  %v508_v59 = vpack.c.bf16 %v208_v52, %v207_v51  ;;  %v134_v39 = vstv %s766_s29 }
  0x5b   :  { %503 = vmatpush3.bf16.msra.mxu1 %v502_v38  ;;  %v768_v60 = vld [vmem:[#allocation10 + $0x50] sm:$0xff]  ;;  %v770_v61 = vld [vmem:[#allocation10 + $0x58] sm:$0xff]  ;;  %v776_v3 = vld [vmem:[#allocation10 + $0xe0] sm:$0xff]  ;;  %v510_v7 = vpack.c.bf16 %v192_v56, %v191_v53  ;;  %v480_v8 = vpack.c.bf16 %v178_v58, %v177_v57 }
  0x5c   :  { %505 = vmatprep.subr.bf16.mxu1 %v504_v43  ;;  %v209_v62 = vld [vmem:[#allocation10 + $0x1d0] sm:$0xff]  ;;  %v210_v63 = vld [vmem:[#allocation10 + $0x1d8] sm:$0xff]  ;;  %v778_v4 = vld [vmem:[#allocation10 + $0xe8] sm:$0xff]  ;;  %v482_v21 = vpack.c.bf16 %v770_v61, %v768_v60 }
  0x5d   :  { %v772_v0 = vld [vmem:[#allocation10 + $0x150] sm:$0xff]  ;;  %v774_v1 = vld [vmem:[#allocation10 + $0x158] sm:$0xff]  ;;  %475 = vmatpush3.bf16.msra.mxu0 %v474_v50  ;;  %v780_v5 = vld [vmem:[#allocation10 + $0x60] sm:$0xff]  ;;  %v512_v14 = vpack.c.bf16 %v210_v63, %v209_v62  ;;  %v484_v29 = vpack.c.bf16 %v778_v4, %v776_v3 }
  0x5e   :  { %477 = vmatprep.subr.bf16.mxu0 %v476_v55  ;;  %v783_v9 = vld [vmem:[#allocation10 + $0x68] sm:$0xff]  ;;  %v211_v10 = vld [vmem:[#allocation10 + $0x1e0] sm:$0xff]  ;;  %v791_v17 = vld [vmem:[#allocation10 + $0xf0] sm:$0xff]  ;;  %v514_v28 = vpack.c.bf16 %v774_v1, %v772_v0 }
  0x5f   :  { %507 = vmatpush3.bf16.msra.mxu1 %v506_v54  ;;  %v212_v11 = vld [vmem:[#allocation10 + $0x1e8] sm:$0xff]  ;;  %v787_v15 = vld [vmem:[#allocation10 + $0x160] sm:$0xff]  ;;  %v798_v22 = vld [vmem:[#allocation10 + $0xf8] sm:$0xff]  ;;  %v486_v30 = vpack.c.bf16 %v783_v9, %v780_v5 }
  0x60   :  { %509 = vmatprep.subr.bf16.mxu1 %v508_v59  ;;  %v789_v16 = vld [vmem:[#allocation10 + $0x168] sm:$0xff]  ;;  %v800_v23 = vld [vmem:[#allocation10 + $0x70] sm:$0xff]  ;;  %v802_v24 = vld [vmem:[#allocation10 + $0x78] sm:$0xff]  ;;  %v516_v31 = vpack.c.bf16 %v212_v11, %v211_v10  ;;  %v488_v35 = vpack.c.bf16 %v798_v22, %v791_v17 }
  0x61   :  { %479 = vmatpush3.bf16.msra.mxu0 %v478_v2  ;;  %v213_v32 = vld [vmem:[#allocation10 + $0x1f0] sm:$0xff]  ;;  %v214_v33 = vld [vmem:[#allocation10 + $0x1f8] sm:$0xff]  ;;  %v518_v34 = vpack.c.bf16 %v789_v16, %v787_v15  ;;  %v490_v36 = vpack.c.bf16 %v802_v24, %v800_v23  ;;  %v79_v37 = vld [vmem:[#allocation9] sm:$0xff] }
  0x62   :  { %481 = vmatprep.subr.bf16.mxu0 %v480_v8  ;;  %v80_v38 = vld [vmem:[#allocation9 + $0x8] sm:$0xff]  ;;  %v520_v40 = vpack.c.bf16 %v214_v33, %v213_v32  ;;  %v84_v41 = vmul.f32 %v83_v12, %v79_v37  ;;  %v97_v43 = vld [vmem:[#allocation9 + $0x10] sm:$0xff]  ;;  %v98_v44 = vld [vmem:[#allocation9 + $0x18] sm:$0xff]  ;;  %v92_v46 = vmul.f32 %v91_v25, %v79_v37 }
  0x63   :  { %511 = vmatpush3.bf16.msra.mxu1 %v510_v7  ;;  %v85_v42 = vmul.f32 %v83_v12, %v80_v38  ;;  %v111_v45 = vld [vmem:[#allocation9 + $0x20] sm:$0xff]  ;;  %v101_v47 = vmul.f32 %v100_v13, %v97_v43  ;;  %v102_v48 = vmul.f32 %v100_v13, %v98_v44  ;;  %v112_v49 = vld [vmem:[#allocation9 + $0x28] sm:$0xff]  ;;  %v125_v51 = vld [vmem:[#allocation9 + $0x30] sm:$0xff]  ;;  %v93_v53 = vmul.f32 %v91_v25, %v80_v38 }
  0x64   :  { %513 = vmatprep.subr.bf16.mxu1 %v512_v14  ;;  %v115_v50 = vmul.f32 %v114_v18, %v111_v45  ;;  %v126_v52 = vld [vmem:[#allocation9 + $0x38] sm:$0xff]  ;;  %v87_v54 = vadd.f32 %v86_v6, %v84_v41  ;;  %v116_v56 = vmul.f32 %v114_v18, %v112_v49  ;;  %v129_v57 = vmul.f32 %v128_v19, %v125_v51  ;;  %v197_v61 = vld [vmem:[#allocation10 + $0x170] sm:$0xff]  ;;  %v389_v23 = vld [vmem:[#allocation12] ss:$0 sm:$0xff] }
  0x65   :  { %483 = vmatpush3.bf16.msra.mxu0 %v482_v21  ;;  %v88_v55 = vadd.f32 %v86_v6, %v85_v42  ;;  %v130_v58 = vmul.f32 %v128_v19, %v126_v52  ;;  %v95_v59 = vadd.f32 %v94_v20, %v92_v46  ;;  %v96_v60 = vadd.f32 %v94_v20, %v93_v53  ;;  %v198_v62 = vld [vmem:[#allocation10 + $0x178] sm:$0xff] }
  0x66   :  { %485 = vmatprep.subr.bf16.mxu0 %v484_v29  ;;  %v103_v0 = vadd.f32 %v101_v47, %v87_v54  ;;  %v107_v1 = vmul.f32 %v106_v26, %v97_v43  ;;  %v108_v2 = vmul.f32 %v106_v26, %v98_v44  ;;  %v121_v3 = vmul.f32 %v120_v27, %v111_v45 }
  0x67   :  { %515 = vmatpush3.bf16.msra.mxu1 %v514_v28  ;;  %v104_v63 = vadd.f32 %v102_v48, %v88_v55  ;;  %v122_v4 = vmul.f32 %v120_v27, %v112_v49  ;;  %v135_v5 = vmul.f32 %v134_v39, %v125_v51  ;;  %v136_v7 = vmul.f32 %v134_v39, %v126_v52 }
  0x68   :  { %517 = vmatprep.subr.bf16.mxu1 %v516_v31  ;;  %v117_v8 = vadd.f32 %v115_v50, %v103_v0  ;;  %v110_v9 = vadd.f32 %v108_v2, %v96_v60  ;;  %v109_v10 = vadd.f32 %v107_v1, %v95_v59  ;;  %v522_v11 = vpack.c.bf16 %v198_v62, %v197_v61 }
  0x69   :  { %487 = vmatpush3.bf16.msra.mxu0 %v486_v30  ;;  %v118_v6 = vadd.f32 %v116_v56, %v104_v63 }
  0x6a   :  { %489 = vmatprep.subr.bf16.mxu0 %v488_v35  ;;  %v131_v13 = vadd.f32 %v129_v57, %v117_v8  ;;  %v124_v14 = vadd.f32 %v122_v4, %v110_v9  ;;  %v123_v15 = vadd.f32 %v121_v3, %v109_v10 }
  0x6b   :  { %519 = vmatpush3.bf16.msra.mxu1 %v518_v34  ;;  %v132_v12 = vadd.f32 %v130_v58, %v118_v6 }
  0x6c   :  { %521 = vmatprep.subr.bf16.mxu1 %v520_v40  ;;  %v139_v17 = vmax.f32 %v131_v13, 0.0  ;;  %v138_v18 = vadd.f32 %v136_v7, %v124_v14  ;;  %v137_v19 = vadd.f32 %v135_v5, %v123_v15 }
  0x6d   :  { %491 = vmatpush3.bf16.msra.mxu0 %v490_v36  ;;  %v140_v16 = vmax.f32 %v132_v12, 0.0 }
  0x6e   :  { %v144_v20 = vmax.f32 %v138_v18, 0.0  ;;  %v143_v21 = vmax.f32 %v137_v19, 0.0 }
  0x6f   :  { %523 = vmatpush3.bf16.msra.mxu1 %v522_v11  ;;  %286 = vmatprep.mubr.f32.mxu0 %v140_v16 }
  0x70   :  { %287 = vmatmul.mubr.f32.vlgmr.msra.gmra.mrb[0].mxu0 %v139_v17  ;;  %356 = vmatprep.mubr.f32.mxu1 %v144_v20 }
  0x72   :  { %357 = vmatmul.mubr.f32.vlgmr.msra.gmra.mrb[0].mxu1 %v143_v21 }
 0x143   :  { %v422_v22 = vpop.f32.mrb[0].mxu0 }
 0x144   :  { %v423_v24 = vpop.f32.mrb[1].mxu0 }
 0x145   :  { %v424_v25 = vadd.f32 %v423_v24, %v422_v22  ;;  %v457_v26 = vpop.f32.mrb[0].mxu1 }
 0x146   :  { %v458_v27 = vpop.f32.mrb[1].mxu1 }
 0x147   :  { %v289_v28 = vadd.f32 %v424_v25, %v389_v23  ;;  %v459_v29 = vadd.f32 %v458_v27, %v457_v26 }
 0x149   :  { %v359_v30 = vadd.f32 %v459_v29, %v289_v28 }
 0x14b   :  { %362 = vst [vmem:[#allocation13] sm:$0xff] %v359_v30 }
 0x14c   :  { %629 = shalt.err (!%p626_p6)
}
 0x14d   :  { %s630_s10 = scalar_lea.hbm %s837_s5, 128 }
 0x14e   :  { %p631_p7 = scmp.ne.s32.totalorder %s837_s5, %s630_s10  ;;  %p634_p8 = scmp.lt.u32.totalorder %s630_s10, %s837_s5 }
 0x150   :  { %p636_p9 = pnand %p634_p8, %p631_p7 }
 0x152   :  { %639 = shalt.err (!%p636_p9)
}
 0x153   :  { %372 = dma.vmem_to_hbm [thread:$0]  %s370_s6, 128, %s837_s5, [#allocation5]  }
 0x154   :  { %648 = dma.done.wait [#allocation5], 128  }
 0x155   :  { %649 = vsyncadd [#allocation5], 4294967168 }
 0x156   :  { %376 = vsyncpa [#allocation4], 1 }
 0x157   :  { %377 = vsyncpa [#allocation11], 1 }
 0x158   :  { %378 = vsyncpa [#allocation5], 1 }
 0x159   :  { %379 = vsyncpa [#allocation6], 1 }
 0x15a   :  { %380 = vsyncpa [#allocation8], 1 }

</bundles_post_ra>
